<compile_context>
chip_gen: v7x
topology: tpu7x:2x2x1
jax: 0.10.0
libtpu: 0.0.40
codegen_flags: <defaults>
</compile_context>

<pallas_src>
import jax
import jax.numpy as jnp
from jax.experimental import pallas as pl
from jax.experimental.pallas import tpu as pltpu  # noqa: F401  (TPU backend; used for scaled-up variants)


def _fused_mlp_kernel(*refs):
    """refs = (x_ref, w0, b0, w1, b1, ..., w_{L-1}, b_{L-1}, o_ref).

    All arrays are at their logical (unpadded) shapes; no grid, whole arrays in
    VMEM.  Layers are unrolled at trace time (static layer count), so each matmul
    hits the MXU back-to-back and activations never leave the chip.
    """
    x_ref, o_ref = refs[0], refs[-1]
    wb = refs[1:-1]
    n_layers = len(wb) // 2

    h = x_ref[...]
    for i in range(n_layers):
        w = wb[2 * i][...]          # (K_i, N_i)
        b = wb[2 * i + 1][...]      # (1, N_i)  -- broadcast once per (unrolled) layer
        y = jnp.dot(h, w, preferred_element_type=jnp.float32) + b
        h = jnp.tanh(y)             # EUP slot; effectively free next to the MXU work
    o_ref[...] = h.astype(o_ref.dtype)


def init_mlp_params(key, net_dims):
    """Deterministic init mimicking torch.nn.Linear default U(-1/sqrt(fan_in), +).

    Weights stored as (in, out) = torch weight transposed; bias as (1, out).
    """
    params = []
    for i in range(len(net_dims) - 1):
        fan_in, fan_out = net_dims[i], net_dims[i + 1]
        key, kw, kb = jax.random.split(key, 3)
        bound = 1.0 / (fan_in ** 0.5)
        w = jax.random.uniform(kw, (fan_in, fan_out), jnp.float32, -bound, bound)
        b = jax.random.uniform(kb, (1, fan_out), jnp.float32, -bound, bound)
        params.append((w, b))
    return tuple(params)


@jax.jit
def nn_mlp_forward(x, params):
    """Fused-MLP forward: one pallas_call for all layers, no wrapper-side pad/slice.

    x: (M, net_dims[0]) f32; params: tuple of (w=(in,out), b=(1,out)) pairs.
    """
    M = x.shape[0]
    out_dim = params[-1][0].shape[1]

    flat = []
    for w, b in params:
        flat.extend((w, b))

    # Advisory cost hint from LOGICAL dims (not padded), so XLA schedules the
    # surrounding graph sensibly.
    flops = sum(2 * M * w.shape[0] * w.shape[1] for w, _ in params)
    transcendentals = sum(M * w.shape[1] for w, _ in params)
    bytes_accessed = (
        x.size * x.dtype.itemsize
        + sum(w.size * w.dtype.itemsize + b.size * b.dtype.itemsize for w, b in params)
        + M * out_dim * 4
    )

    return pl.pallas_call(
        _fused_mlp_kernel,
        out_shape=jax.ShapeDtypeStruct((M, out_dim), jnp.float32),
        # No grid: whole (tiny) arrays live in VMEM; single flat call. Footprint
        # here is a few KiB, well under the default scoped-VMEM limit everywhere.
        cost_estimate=pl.CostEstimate(
            flops=flops,
            transcendentals=transcendentals,
            bytes_accessed=bytes_accessed,
        ),
    )(x, *flat)
    # TODO(synk): for realistic M, add grid=(M//TM,) with
    # dimension_semantics=("parallel",) and constant index_maps for (w, b) so
    # weights DMA once while x/out tiles stream (2 TCs on v7x).


if __name__ == "__main__":
    # Small shapes consistent with the module: net_dims defines the MLP widths.
    net_dims = [16, 32, 32, 8]
    batch = 8

    key = jax.random.PRNGKey(0)
    key, kx = jax.random.split(key)
    x = jax.random.normal(kx, (batch, net_dims[0]), jnp.float32)

    params = init_mlp_params(jax.random.PRNGKey(0), net_dims)

    out = nn_mlp_forward(x, params)
    out = jax.block_until_ready(out)

    # Pure-JAX reference of the same forward (dropout p=0 -> identity).
    ref = x
    for w, b in params:
        ref = jnp.tanh(ref @ w + b)

    assert out.shape == (batch, net_dims[-1])
    assert jnp.allclose(out, ref, atol=1e-5, rtol=1e-5)

    print("KERNEL_OK")
</pallas_src>

<mosaic_0001>
module attributes {stable_mosaic.version = 11 : i64} {
  func.func @_fused_mlp_kernel(%arg0: memref<8x16xf32, #tpu.memory_space<vmem>>, %arg1: memref<16x32xf32, #tpu.memory_space<vmem>>, %arg2: memref<1x32xf32, #tpu.memory_space<vmem>>, %arg3: memref<32x32xf32, #tpu.memory_space<vmem>>, %arg4: memref<1x32xf32, #tpu.memory_space<vmem>>, %arg5: memref<32x8xf32, #tpu.memory_space<vmem>>, %arg6: memref<1x8xf32, #tpu.memory_space<vmem>>, %arg7: memref<8x8xf32, #tpu.memory_space<vmem>>) attributes {dimension_semantics = [], scalar_prefetch = 0 : i64, scratch_operands = 0 : i64, tpu.core_type = #tpu.core_type<tc>} {
    %c0 = arith.constant 0 : index
    %c0_0 = arith.constant 0 : index
    %0 = vector.load %arg0[%c0, %c0_0] : memref<8x16xf32, #tpu.memory_space<vmem>>, vector<8x16xf32>
    %c0_1 = arith.constant 0 : index
    %c0_2 = arith.constant 0 : index
    %1 = vector.load %arg1[%c0_1, %c0_2] : memref<16x32xf32, #tpu.memory_space<vmem>>, vector<16x32xf32>
    %c0_3 = arith.constant 0 : index
    %c0_4 = arith.constant 0 : index
    %2 = vector.load %arg2[%c0_3, %c0_4] : memref<1x32xf32, #tpu.memory_space<vmem>>, vector<1x32xf32>
    %cst = arith.constant dense<0.000000e+00> : vector<8x32xf32>
    %3 = tpu.matmul %0, %1, %cst {dimension_numbers = #tpu.dot_dimension_numbers<[1], [0], [0], [1], [0, 0, 1, 1], [], []>} : vector<8x16xf32>, vector<16x32xf32>, vector<8x32xf32> -> vector<8x32xf32>
    %4 = vector.broadcast %2 : vector<1x32xf32> to vector<8x32xf32>
    %5 = arith.addf %3, %4 : vector<8x32xf32>
    %6 = math.tanh %5 : vector<8x32xf32>
    %c0_5 = arith.constant 0 : index
    %c0_6 = arith.constant 0 : index
    %7 = vector.load %arg3[%c0_5, %c0_6] : memref<32x32xf32, #tpu.memory_space<vmem>>, vector<32x32xf32>
    %c0_7 = arith.constant 0 : index
    %c0_8 = arith.constant 0 : index
    %8 = vector.load %arg4[%c0_7, %c0_8] : memref<1x32xf32, #tpu.memory_space<vmem>>, vector<1x32xf32>
    %cst_9 = arith.constant dense<0.000000e+00> : vector<8x32xf32>
    %9 = tpu.matmul %6, %7, %cst_9 {dimension_numbers = #tpu.dot_dimension_numbers<[1], [0], [0], [1], [0, 0, 1, 1], [], []>} : vector<8x32xf32>, vector<32x32xf32>, vector<8x32xf32> -> vector<8x32xf32>
    %10 = vector.broadcast %8 : vector<1x32xf32> to vector<8x32xf32>
    %11 = arith.addf %9, %10 : vector<8x32xf32>
    %12 = math.tanh %11 : vector<8x32xf32>
    %c0_10 = arith.constant 0 : index
    %c0_11 = arith.constant 0 : index
    %13 = vector.load %arg5[%c0_10, %c0_11] : memref<32x8xf32, #tpu.memory_space<vmem>>, vector<32x8xf32>
    %c0_12 = arith.constant 0 : index
    %c0_13 = arith.constant 0 : index
    %14 = vector.load %arg6[%c0_12, %c0_13] : memref<1x8xf32, #tpu.memory_space<vmem>>, vector<1x8xf32>
    %cst_14 = arith.constant dense<0.000000e+00> : vector<8x8xf32>
    %15 = tpu.matmul %12, %13, %cst_14 {dimension_numbers = #tpu.dot_dimension_numbers<[1], [0], [0], [1], [0, 0, 1, 1], [], []>} : vector<8x32xf32>, vector<32x8xf32>, vector<8x8xf32> -> vector<8x8xf32>
    %16 = vector.broadcast %14 : vector<1x8xf32> to vector<8x8xf32>
    %17 = arith.addf %15, %16 : vector<8x8xf32>
    %18 = math.tanh %17 : vector<8x8xf32>
    %c0_15 = arith.constant 0 : index
    %c0_16 = arith.constant 0 : index
    %19 = vector.load %arg7[%c0_15, %c0_16] : memref<8x8xf32, #tpu.memory_space<vmem>>, vector<8x8xf32>
    tpu.vector_store %arg7[%c0_15, %c0_16], %18 {strides = array<i32>} : memref<8x8xf32, #tpu.memory_space<vmem>>, vector<8x8xf32>,
    return
  }
}

</mosaic_0001>

<bundles_post_ra>
// kernel: nn_mlp_forward.1
= control target key start
LH: loop header
LB: loop body
LE: loop exit
PB: predicated region body
PF: predicated region fallthrough
CT: control target
= control target key end

     0   :  { %12 = vsyncpa [#allocation3], 0  ;;  %s544_s0 = inlined_call_operand.hbm [shape: f32[8,16], index: 0, kind: input, shape index: {}]   ;;  %s545_s1 = inlined_call_operand.vmem [shape: f32[16,32], index: 1, kind: input, shape index: {}]   ;;  %s546_s2 = inlined_call_operand.vmem [shape: f32[1,32], index: 2, kind: input, shape index: {}]   ;;  %s547_s3 = inlined_call_operand.vmem [shape: f32[32,32], index: 3, kind: input, shape index: {}]   ;;  %s548_s4 = inlined_call_operand.vmem [shape: f32[1,32], index: 4, kind: input, shape index: {}]   ;;  %s549_s5 = inlined_call_operand.vmem [shape: f32[32,8], index: 5, kind: input, shape index: {}]   ;;  %s550_s6 = inlined_call_operand.vmem [shape: f32[1,8], index: 6, kind: input, shape index: {}]   ;;  %s551_s7 = inlined_call_operand.hbm [shape: f32[8,8], index: 7, kind: output, shape index: {}]  }
   0x1   :  { %13 = vsyncpa [#allocation4], 0  ;;  %s434_s24 = smov [#allocation2]   ;;  %s386_s28 = scalar_lea.hbm %s544_s0, 128 }
   0x2   :  { %s20_s25 = sshll.u32 %s434_s24, 4  ;;  %p387_p0 = scmp.ne.s32.totalorder %s544_s0, %s386_s28  ;;  %s21_s25 = int_to_ptr.vmem [resolvable:$true] %s20_s25 }
   0x3   :  { %p390_p1 = scmp.lt.u32.totalorder %s386_s28, %s544_s0 }
   0x5   :  { %p392_p2 = pnand %p390_p1, %p387_p0 }
   0x7   :  { %395 = shalt.err (!%p392_p2)
}
   0x8   :  { %s396_s10 = scalar_lea.vmem %s21_s25, 128  ;;  %p401_p4 = scmp.lt.s32.totalorder %s21_s25, %s21_s25 }
   0x9   :  { %p397_p3 = scmp.ne.s32.totalorder %s21_s25, %s396_s10  ;;  %p402_p5 = scmp.lt.s32.totalorder %s396_s10, %s396_s10 }
   0xb   :  { %p403_p6 = por %p402_p5, %p401_p4 }
   0xd   :  { %p404_p7 = pnand %p403_p6, %p397_p3 }
   0xf   :  { %407 = shalt.err (!%p404_p7)
}
  0x10   :  { %23 = dma.hbm_to_vmem [thread:$0]  %s544_s0, 128, %s21_s25, [#allocation3]  }
  0x11   :  { %430 = dma.done.wait [#allocation3], 128  }
  0x12   :  { %431 = vsyncadd [#allocation3], 4294967168  ;;  %v435_v0 = vmov 0.0|0.0   ;;  %vm436_vm0 = vmmov 0   ;;  %v437_v1 = vmov 0.0   ;;  %v40_v2 = vld [vmem:[%s545_s1] sm:$0xff] }
  0x13   :  { %360 = vmatprep.subr.bf16.mxu0 %v435_v0  ;;  %335 = vmatprep.mubr.msk.f32.mxu0 %vm436_vm0, %v437_v1  ;;  %v41_v3 = vld [vmem:[%s545_s1 + $0x8] sm:$0xff]  ;;  %v39_v5 = vld [vmem:[#allocation2] sm:$0xff]  ;;  %vm49_vm1 = vcmask 130048   ;;  %v126_v8 = vld [vmem:[%s547_s3 + $0x10] sm:$0xff]  ;;  %vm135_vm2 = vcmask 261120   ;;  %vm295_vm3 = vcmask 64512  }
  0x14   :  { %363 = vmatprep.subr.bf16.mxu1 %v435_v0  ;;  %346 = vmatprep.mubr.msk.f32.mxu1 %vm436_vm0, %v437_v1  ;;  %v361_v4 = vpack.c.bf16 %v41_v3, %v40_v2  ;;  %v124_v6 = vld [vmem:[%s547_s3] sm:$0xff]  ;;  %v125_v7 = vld [vmem:[%s547_s3 + $0x8] sm:$0xff]  ;;  %v127_v10 = vld [vmem:[%s547_s3 + $0x18] sm:$0xff] }
  0x15   :  { %v364_v9 = vpack.c.bf16 %v125_v7, %v124_v6  ;;  %v367_v11 = vpack.c.bf16 %v127_v10, %v126_v8  ;;  %v312_v12 = vld [vmem:[%s546_s2] ss:$0 sm:$0xff]  ;;  %v211_v18 = vld [vmem:[%s549_s5 + $0x8] sm:$0xff]  ;;  %v212_v19 = vld [vmem:[%s549_s5 + $0x10] sm:$0xff] }
  0x16   :  { %362 = vmatpush3.bf16.msra.mxu0 %v361_v4  ;;  %v210_v17 = vld [vmem:[%s549_s5] sm:$0xff]  ;;  %v213_v21 = vld [vmem:[%s549_s5 + $0x18] sm:$0xff]  ;;  %s438_s5 = smov [#allocation5]  }
  0x17   :  { %369 = vmatprep.subr.bf16.mxu0 %v435_v0  ;;  %365 = vmatpush3.bf16.msra.mxu1 %v364_v9  ;;  %v370_v20 = vpack.c.bf16 %v211_v18, %v210_v17  ;;  %v373_v22 = vpack.c.bf16 %v213_v21, %v212_v19  ;;  %v314_v23 = vld [vmem:[%s548_s4] ss:$0 sm:$0xff]  ;;  %s303_s12 = sshll.u32 %s438_s5, 4  ;;  %s304_s12 = int_to_ptr.vmem [resolvable:$true] %s303_s12 }
  0x18   :  { %366 = vmatprep.subr.bf16.mxu1 %v435_v0  ;;  %v316_v28 = vld [vmem:[%s550_s6] ss:$0 sm:$0xff]  ;;  %s408_s4 = scalar_lea.vmem %s304_s12, 128  ;;  %p413_p9 = scmp.lt.s32.totalorder %s304_s12, %s304_s12 }
  0x19   :  { %336 = vmatmul.mubr.msk.f32.vlgmr.msra.gmra.mrb[0].mxu0 %vm49_vm1, %v39_v5  ;;  %p409_p8 = scmp.ne.s32.totalorder %s304_s12, %s408_s4  ;;  %p414_p10 = scmp.lt.s32.totalorder %s408_s4, %s408_s4 }
  0x1a   :  { %357 = vmatprep.mubr.msk.f32.mxu0 %vm436_vm0, %v437_v1  ;;  %371 = vmatpush3.bf16.msra.mxu0 %v370_v20 }
  0x1b   :  { %368 = vmatpush3.bf16.msra.mxu1 %v367_v11  ;;  %372 = vmatprep.subr.bf16.mxu0 %v435_v0  ;;  %p415_p11 = por %p414_p10, %p413_p9 }
  0x1d   :  { %p416_p12 = pnand %p415_p11, %p409_p8 }
  0x1e   :  { %374 = vmatpush3.bf16.msra.mxu0 %v373_v22 }
  0xec   :  { %v119_v13 = vpop.f32.mrb[0].mxu0 }
  0xed   :  { %v120_v14 = vadd.f32 %v312_v12, %v119_v13  ;;  %v337_v15 = vpop.f32.mrb[1].mxu0 }
  0xef   :  { %380 = vtanh.f32 %v120_v14 }
  0xf9   :  { %v381_v16 = vpop.eup %380 }
  0xfa   :  { %347 = vmatmul.mubr.msk.f32.vlgmr.msra.gmra.mrb[0].mxu1 %vm135_vm2, %v381_v16 }
 0x1cd   :  { %v205_v24 = vpop.f32.mrb[0].mxu1 }
 0x1ce   :  { %v206_v25 = vadd.f32 %v314_v23, %v205_v24  ;;  %v348_v26 = vpop.f32.mrb[1].mxu1 }
 0x1d0   :  { %382 = vtanh.f32 %v206_v25 }
 0x1da   :  { %v383_v27 = vpop.eup %382 }
 0x1db   :  { %358 = vmatmul.mubr.msk.f32.vlgmr.msra.gmra.mrb[2].mxu0 %vm135_vm2, %v383_v27 }
 0x2ae   :  { %v290_v29 = vpop.f32.mrb[2].mxu0 }
 0x2af   :  { %v291_v30 = vadd.f32 %v316_v28, %v290_v29  ;;  %v359_v31 = vpop.f32.mrb[3].mxu0 }
 0x2b1   :  { %384 = vtanh.f32 %v291_v30 }
 0x2bb   :  { %v385_v32 = vpop.eup %384 }
 0x2bc   :  { %296 = vst.msk [vmem:[#allocation5] sm:$0xff] %vm295_vm3, %v385_v32 }
 0x2bd   :  { %419 = shalt.err (!%p416_p12)
}
 0x2be   :  { %s420_s6 = scalar_lea.hbm %s551_s7, 128 }
 0x2bf   :  { %p421_p13 = scmp.ne.s32.totalorder %s551_s7, %s420_s6  ;;  %p424_p0 = scmp.lt.u32.totalorder %s420_s6, %s551_s7 }
 0x2c1   :  { %p426_p1 = pnand %p424_p0, %p421_p13 }
 0x2c3   :  { %429 = shalt.err (!%p426_p1)
}
 0x2c4   :  { %306 = dma.vmem_to_hbm [thread:$0]  %s304_s12, 128, %s551_s7, [#allocation4]  }
 0x2c5   :  { %432 = dma.done.wait [#allocation4], 128  }
 0x2c6   :  { %433 = vsyncadd [#allocation4], 4294967168 }
 0x2c7   :  { %310 = vsyncpa [#allocation3], 1 }
 0x2c8   :  { %311 = vsyncpa [#allocation4], 1 }

</bundles_post_ra>
